<compile_context>
chip_gen: v7x
topology: tpu7x:2x2x1
jax: 0.10.0
libtpu: 0.0.40
codegen_flags: <defaults>
</compile_context>

<pallas_src>
import math
from functools import partial

import jax
import jax.numpy as jnp
from jax.experimental import pallas as pl
from jax.experimental.pallas import tpu as pltpu


def _round_up(x: int, m: int) -> int:
    return (x + m - 1) // m * m


def _lora_linear_kernel(x_ref, wT_ref, aT_ref, bT_ref, o_ref, xa_ref, *, scaling):
    """One (tile_m x tile_n) output tile per grid step.

    y = x @ W^T + (scaling * (x @ A^T)) @ B^T   (dropout == identity in eval mode)
    """
    j = pl.program_id(1)

    # x @ A^T is independent of the N tile: compute it once per M tile and keep
    # the scaled / cast (tm, r) result resident in VMEM scratch.
    @pl.when(j == 0)
    def _():
        xa = jnp.dot(x_ref[...], aT_ref[...], preferred_element_type=jnp.float32)
        xa_ref[...] = (scaling * xa).astype(xa_ref.dtype)

    base = jnp.dot(x_ref[...], wT_ref[...], preferred_element_type=jnp.float32)   # (tm, tn)
    lora = jnp.dot(xa_ref[...], bT_ref[...], preferred_element_type=jnp.float32)  # (tm, tn)
    # Epilogue stays in f32 (single add + cast), lane-dense store.
    o_ref[...] = (base + lora).astype(o_ref.dtype)


def prepare_lora_params(weight, lora_A, lora_B, compute_dtype=None):
    """Transpose (and optionally cast) parameters ONCE, outside the hot path."""
    wT = weight.T          # (in, out)
    aT = lora_A.T          # (in, r)
    bT = lora_B.T          # (r, out)
    if compute_dtype is not None:
        wT = wT.astype(compute_dtype)
        aT = aT.astype(compute_dtype)
        bT = bT.astype(compute_dtype)
    return wT, aT, bT


def lora_linear_pretransposed(x, wT, aT, bT, scaling, *, tile_m=256, tile_n=512,
                              compute_dtype=None):
    """x: (..., in). wT: (in, out). aT: (in, r). bT: (r, out)."""
    in_features = x.shape[-1]
    out_features = wT.shape[1]
    r = aT.shape[1]
    assert wT.shape[0] == in_features and aT.shape[0] == in_features
    assert bT.shape == (r, out_features)

    lead = x.shape[:-1]
    M = 1
    for d in lead:
        M *= d
    x2 = x.reshape(M, in_features)
    out_dtype = x.dtype

    if compute_dtype is not None:
        x2 = x2.astype(compute_dtype)
        wT = wT.astype(compute_dtype)
        aT = aT.astype(compute_dtype)
        bT = bT.astype(compute_dtype)
    cdtype = x2.dtype
    itm = jnp.dtype(cdtype).itemsize
    ito = jnp.dtype(out_dtype).itemsize

    # Tile sizes: big tiles, clamped to the (padded) problem so tiny shapes still
    # work.  Row multiple 8 for 4-byte dtypes, 16 for 2-byte (bf16 sublane packing).
    # Output N tile padded to >=128 lanes => unmasked, lane-dense stores.
    row_mult = 8 if itm >= 4 else 16
    tm = _round_up(min(int(tile_m), _round_up(M, row_mult)), row_mult)
    tn = _round_up(min(int(tile_n), _round_up(out_features, 128)), 128)

    def blk_bytes(tm_, tn_):
        # Double-buffered streaming blocks + output tile + resident xa scratch.
        return (2 * tm_ * in_features * itm        # x tile
                + 2 * in_features * tn_ * itm      # W^T tile (streamed over N)
                + 2 * in_features * r * itm        # A^T (tiny, grid-invariant)
                + 2 * r * tn_ * itm                # B^T tile (streamed over N)
                + 2 * tm_ * tn_ * ito              # output tile
                + tm_ * max(r, 128) * itm)         # xa scratch (lane-padded)

    # Keep blocks within ~40 MiB so we stay comfortably inside v7x's 64 MiB VMEM.
    VMEM_BUDGET = 40 * 2**20
    while blk_bytes(tm, tn) > VMEM_BUDGET and tn > 128:
        tn = max(128, _round_up(tn // 2, 128))
    while blk_bytes(tm, tn) > VMEM_BUDGET and tm > row_mult:
        tm = max(row_mult, _round_up(tm // 2, row_mult))

    M_pad = _round_up(M, tm)
    N_pad = _round_up(out_features, tn)

    if M_pad != M:
        x2 = jnp.pad(x2, ((0, M_pad - M), (0, 0)))
    if N_pad != out_features:
        wT = jnp.pad(wT, ((0, 0), (0, N_pad - out_features)))
        bT = jnp.pad(bT, ((0, 0), (0, N_pad - out_features)))

    grid = (M_pad // tm, N_pad // tn)

    # Advisory cost estimate for XLA scheduling around the custom call.
    flops = 2 * M * (in_features * out_features + in_features * r + r * out_features)
    bytes_accessed = int(
        x2.size * x2.dtype.itemsize
        + wT.size * wT.dtype.itemsize
        + aT.size * aT.dtype.itemsize
        + bT.size * bT.dtype.itemsize
        + M_pad * N_pad * ito
    )

    vmem_limit = int(min(max(int(1.25 * blk_bytes(tm, tn)), 32 * 2**20), 64 * 2**20))

    out2 = pl.pallas_call(
        partial(_lora_linear_kernel, scaling=float(scaling)),
        out_shape=jax.ShapeDtypeStruct((M_pad, N_pad), out_dtype),
        grid_spec=pltpu.PrefetchScalarGridSpec(
            num_scalar_prefetch=0,
            grid=grid,
            in_specs=[
                pl.BlockSpec((tm, in_features), lambda i, j: (i, 0)),
                pl.BlockSpec((in_features, tn), lambda i, j: (0, j)),
                pl.BlockSpec((in_features, r), lambda i, j: (0, 0)),
                pl.BlockSpec((r, tn), lambda i, j: (0, j)),
            ],
            out_specs=pl.BlockSpec((tm, tn), lambda i, j: (i, j)),
            scratch_shapes=[pltpu.VMEM((tm, r), cdtype)],
        ),
        compiler_params=pltpu.CompilerParams(
            # N axis is "arbitrary": the xa scratch computed at j==0 must be reused
            # for all j of the same M tile on the same core.
            dimension_semantics=("parallel", "arbitrary"),
            vmem_limit_bytes=vmem_limit,
        ),
        cost_estimate=pl.CostEstimate(
            flops=flops, transcendentals=0, bytes_accessed=bytes_accessed),
    )(x2, wT, aT, bT)

    out2 = out2[:M, :out_features]
    return out2.reshape(*lead, out_features)


def lora_linear(x, weight, lora_A, lora_B, scaling, *, tile_m=256, tile_n=512,
                compute_dtype=None):
    """Convenience wrapper.  For production, call prepare_lora_params() once at
    parameter-load time and use lora_linear_pretransposed() in the hot path."""
    wT, aT, bT = prepare_lora_params(weight, lora_A, lora_B, compute_dtype)
    return lora_linear_pretransposed(x, wT, aT, bT, scaling, tile_m=tile_m,
                                     tile_n=tile_n, compute_dtype=compute_dtype)


def _kaiming_uniform(key, shape, fan_in):
    # matches nn.init.kaiming_uniform_(w, a=sqrt(5)):
    # gain = sqrt(2/(1+5)) = sqrt(1/3); bound = gain*sqrt(3/fan_in) = 1/sqrt(fan_in)
    bound = 1.0 / math.sqrt(fan_in)
    return jax.random.uniform(key, shape, jnp.float32, -bound, bound)


if __name__ == "__main__":
    batch, seq = 2, 8
    in_features, out_features = 32, 64
    r, alpha = 8, 16
    scaling = alpha / r

    key = jax.random.PRNGKey(0)
    kx, kw, ka, kb, kx2, kw2, kb2 = jax.random.split(key, 7)

    x = jax.random.normal(kx, (batch, seq, in_features), jnp.float32)
    weight = _kaiming_uniform(kw, (out_features, in_features), in_features)
    lora_A = _kaiming_uniform(ka, (r, in_features), in_features)
    lora_B = jnp.zeros((out_features, r), jnp.float32)        # module's actual init
    lora_B_nz = _kaiming_uniform(kb, (out_features, r), r)    # exercise the LoRA path

    def ref_fn(xx, W, A, B):
        return xx @ W.T + scaling * ((xx @ A.T) @ B.T)

    # f32 path; transposes done once outside the per-call hot path.
    for B in (lora_B, lora_B_nz):
        wT, aT, bT = prepare_lora_params(weight, lora_A, B)
        out = jax.block_until_ready(lora_linear_pretransposed(x, wT, aT, bT, scaling))
        assert out.shape == (batch, seq, out_features)
        assert jnp.allclose(out, ref_fn(x, weight, lora_A, B), atol=1e-4, rtol=1e-4), \
            "f32 mismatch"

    # Multi-N-tile case (tile_n=128, out=256 => 2 N tiles) exercises the
    # xa-scratch reuse across j > 0.
    out_big = 256
    weight2 = _kaiming_uniform(kw2, (out_big, in_features), in_features)
    lora_B2 = _kaiming_uniform(kb2, (out_big, r), r)
    out_m = jax.block_until_ready(
        lora_linear(x, weight2, lora_A, lora_B2, scaling, tile_n=128))
    assert out_m.shape == (batch, seq, out_big)
    assert jnp.allclose(out_m, ref_fn(x, weight2, lora_A, lora_B2),
                        atol=1e-4, rtol=1e-4), "multi-N-tile mismatch"

    # Ragged leading shape (M = 15) exercises the padding path (no tile-multiple assert).
    x_ragged = jax.random.normal(kx2, (3, 5, in_features), jnp.float32)
    out_r = jax.block_until_ready(
        lora_linear(x_ragged, weight, lora_A, lora_B_nz, scaling))
    assert out_r.shape == (3, 5, out_features)
    assert jnp.allclose(out_r, ref_fn(x_ragged, weight, lora_A, lora_B_nz),
                        atol=1e-4, rtol=1e-4), "ragged-M mismatch"

    # bf16 matmul inputs, f32 accumulation (v6e/v7x MXU path); loose tolerance.
    out_bf = jax.block_until_ready(
        lora_linear(x, weight, lora_A, lora_B_nz, scaling,
                    compute_dtype=jnp.bfloat16))
    assert out_bf.shape == (batch, seq, out_features)
    assert jnp.allclose(out_bf, ref_fn(x, weight, lora_A, lora_B_nz),
                        atol=1e-1, rtol=1e-1), "bf16 path mismatch"

    print("KERNEL_OK")
</pallas_src>

<mosaic_0001>
module attributes {stable_mosaic.version = 11 : i64} {
  func.func @_lora_linear_kernel(%arg0: i32, %arg1: i32, %arg2: memref<16x32xf32, #tpu.memory_space<vmem>>, %arg3: memref<32x128xf32, #tpu.memory_space<vmem>>, %arg4: memref<32x8xf32, #tpu.memory_space<vmem>>, %arg5: memref<8x128xf32, #tpu.memory_space<vmem>>, %arg6: memref<16x128xf32, #tpu.memory_space<vmem>>, %arg7: memref<16x8xf32, #tpu.memory_space<vmem>>) attributes {dimension_semantics = [#tpu.dimension_semantics<parallel>, #tpu.dimension_semantics<arbitrary>], iteration_bounds = array<i64: 1, 1>, scalar_prefetch = 0 : i64, scratch_operands = 1 : i64, tpu.core_type = #tpu.core_type<tc>, window_params = [{transform_indices = @transform_0, window_bounds = array<i64: 16, 32>}, {transform_indices = @transform_1, window_bounds = array<i64: 32, 128>}, {pipeline_mode = #tpu.pipeline_mode<synchronous>, transform_indices = @transform_2, window_bounds = array<i64: 32, 8>}, {transform_indices = @transform_3, window_bounds = array<i64: 8, 128>}, {transform_indices = @transform_4, window_bounds = array<i64: 16, 128>}]} {
    %c0_i32 = arith.constant 0 : i32
    %0 = arith.cmpi eq, %arg1, %c0_i32 : i32
    %1 = arith.extui %0 : i1 to i32
    %c0_i32_0 = arith.constant 0 : i32
    %2 = arith.cmpi ne, %1, %c0_i32_0 : i32
    scf.if %2 {
      %c0_11 = arith.constant 0 : index
      %c0_12 = arith.constant 0 : index
      %11 = vector.load %arg2[%c0_11, %c0_12] : memref<16x32xf32, #tpu.memory_space<vmem>>, vector<16x32xf32>
      %c0_13 = arith.constant 0 : index
      %c0_14 = arith.constant 0 : index
      %12 = vector.load %arg4[%c0_13, %c0_14] : memref<32x8xf32, #tpu.memory_space<vmem>>, vector<32x8xf32>
      %cst_15 = arith.constant dense<0.000000e+00> : vector<16x8xf32>
      %13 = tpu.matmul %11, %12, %cst_15 {dimension_numbers = #tpu.dot_dimension_numbers<[1], [0], [0], [1], [0, 0, 1, 1], [], []>} : vector<16x32xf32>, vector<32x8xf32>, vector<16x8xf32> -> vector<16x8xf32>
      %cst_16 = arith.constant 2.000000e+00 : f32
      %14 = vector.broadcast %cst_16 : f32 to vector<16x8xf32>
      %15 = arith.mulf %14, %13 : vector<16x8xf32>
      %c0_17 = arith.constant 0 : index
      %c0_18 = arith.constant 0 : index
      %16 = vector.load %arg7[%c0_17, %c0_18] : memref<16x8xf32, #tpu.memory_space<vmem>>, vector<16x8xf32>
      tpu.vector_store %arg7[%c0_17, %c0_18], %15 {strides = array<i32>} : memref<16x8xf32, #tpu.memory_space<vmem>>, vector<16x8xf32>,
    } else {
    }
    %c0 = arith.constant 0 : index
    %c0_1 = arith.constant 0 : index
    %3 = vector.load %arg2[%c0, %c0_1] : memref<16x32xf32, #tpu.memory_space<vmem>>, vector<16x32xf32>
    %c0_2 = arith.constant 0 : index
    %c0_3 = arith.constant 0 : index
    %4 = vector.load %arg3[%c0_2, %c0_3] : memref<32x128xf32, #tpu.memory_space<vmem>>, vector<32x128xf32>
    %cst = arith.constant dense<0.000000e+00> : vector<16x128xf32>
    %5 = tpu.matmul %3, %4, %cst {dimension_numbers = #tpu.dot_dimension_numbers<[1], [0], [0], [1], [0, 0, 1, 1], [], []>} : vector<16x32xf32>, vector<32x128xf32>, vector<16x128xf32> -> vector<16x128xf32>
    %c0_4 = arith.constant 0 : index
    %c0_5 = arith.constant 0 : index
    %6 = vector.load %arg7[%c0_4, %c0_5] : memref<16x8xf32, #tpu.memory_space<vmem>>, vector<16x8xf32>
    %c0_6 = arith.constant 0 : index
    %c0_7 = arith.constant 0 : index
    %7 = vector.load %arg5[%c0_6, %c0_7] : memref<8x128xf32, #tpu.memory_space<vmem>>, vector<8x128xf32>
    %cst_8 = arith.constant dense<0.000000e+00> : vector<16x128xf32>
    %8 = tpu.matmul %6, %7, %cst_8 {dimension_numbers = #tpu.dot_dimension_numbers<[1], [0], [0], [1], [0, 0, 1, 1], [], []>} : vector<16x8xf32>, vector<8x128xf32>, vector<16x128xf32> -> vector<16x128xf32>
    %9 = arith.addf %5, %8 : vector<16x128xf32>
    %c0_9 = arith.constant 0 : index
    %c0_10 = arith.constant 0 : index
    %10 = vector.load %arg6[%c0_9, %c0_10] : memref<16x128xf32, #tpu.memory_space<vmem>>, vector<16x128xf32>
    tpu.vector_store %arg6[%c0_9, %c0_10], %9 {strides = array<i32>} : memref<16x128xf32, #tpu.memory_space<vmem>>, vector<16x128xf32>,
    return
  }
  func.func @transform_0(%arg0: i32, %arg1: i32) -> (i32, i32) {
    %c0_i32 = arith.constant 0 : i32
    %c0_i32_0 = arith.constant 0 : i32
    return %arg0, %c0_i32 : i32, i32
  }
  func.func @transform_1(%arg0: i32, %arg1: i32) -> (i32, i32) {
    %c0_i32 = arith.constant 0 : i32
    %c0_i32_0 = arith.constant 0 : i32
    return %c0_i32, %arg1 : i32, i32
  }
  func.func @transform_2(%arg0: i32, %arg1: i32) -> (i32, i32) {
    %c0_i32 = arith.constant 0 : i32
    %c0_i32_0 = arith.constant 0 : i32
    %c0_i32_1 = arith.constant 0 : i32
    return %c0_i32, %c0_i32_0 : i32, i32
  }
  func.func @transform_3(%arg0: i32, %arg1: i32) -> (i32, i32) {
    %c0_i32 = arith.constant 0 : i32
    %c0_i32_0 = arith.constant 0 : i32
    return %c0_i32, %arg1 : i32, i32
  }
  func.func @transform_4(%arg0: i32, %arg1: i32) -> (i32, i32) {
    %c0_i32 = arith.constant 0 : i32
    return %arg0, %arg1 : i32, i32
  }
}

</mosaic_0001>

<bundles_post_ra>
// kernel: tpu_custom_call.1
= control target key start
LH: loop header
LB: loop body
LE: loop exit
PB: predicated region body
PF: predicated region fallthrough
CT: control target
= control target key end

     0   :  { %9 = vsyncpa [#allocation4], 0  ;;  %s529_s0 = inlined_call_operand.hbm [shape: f32[16,32], index: 0, kind: input, shape index: {}]   ;;  %s530_s1 = inlined_call_operand.vmem [shape: f32[32,128], index: 1, kind: input, shape index: {}]   ;;  %s531_s2 = inlined_call_operand.vmem [shape: f32[32,8], index: 2, kind: input, shape index: {}]   ;;  %s532_s3 = inlined_call_operand.vmem [shape: f32[8,128], index: 3, kind: input, shape index: {}]   ;;  %s533_s4 = inlined_call_operand.hbm [shape: f32[16,128], index: 4, kind: output, shape index: {}]  }
   0x1   :  { %10 = vsyncpa [#allocation5], 0  ;;  %s439_s15 = smov [#allocation3]   ;;  %s391_s19 = scalar_lea.hbm %s529_s0, 256 }
   0x2   :  { %s16_s16 = sshll.u32 %s439_s15, 4  ;;  %p392_p0 = scmp.ne.s32.totalorder %s529_s0, %s391_s19  ;;  %s17_s16 = int_to_ptr.vmem [resolvable:$true] %s16_s16 }
   0x3   :  { %p395_p1 = scmp.lt.u32.totalorder %s391_s19, %s529_s0 }
   0x5   :  { %p397_p2 = pnand %p395_p1, %p392_p0 }
   0x7   :  { %400 = shalt.err (!%p397_p2)
}
   0x8   :  { %s401_s24 = scalar_lea.vmem %s17_s16, 256  ;;  %p406_p4 = scmp.lt.s32.totalorder %s17_s16, %s17_s16 }
   0x9   :  { %p402_p3 = scmp.ne.s32.totalorder %s17_s16, %s401_s24  ;;  %p407_p5 = scmp.lt.s32.totalorder %s401_s24, %s401_s24 }
   0xb   :  { %p408_p6 = por %p407_p5, %p406_p4 }
   0xd   :  { %p409_p7 = pnand %p408_p6, %p402_p3 }
   0xf   :  { %412 = shalt.err (!%p409_p7)
}
  0x10   :  { %s440_s25 = smov 128   ;;  %s441_s26 = smov 8  }
  0x11   :  { %22 = dma.hbm_to_vmem [thread:$0]  %s529_s0, 256, %s17_s16, [#allocation4], %s440_s25, %s440_s25, %s441_s26  }
  0x12   :  { %435 = dma.done.wait [#allocation4], 256  }
  0x13   :  { %436 = vsyncadd [#allocation4], 4294967040  ;;  %vm42_vm0 = vcmask 261120   ;;  %v38_v0 = vld [vmem:[%s531_s2] sm:$0xff]  ;;  %v39_v1 = vld [vmem:[%s531_s2 + $0x8] sm:$0xff]  ;;  %vm126_vm1 = vcmask 64512  }
  0x14   :  { %v40_v2 = vld [vmem:[%s531_s2 + $0x10] sm:$0xff]  ;;  %v369_v3 = vpack.c.bf16 %v39_v1, %v38_v0  ;;  %v41_v4 = vld [vmem:[%s531_s2 + $0x18] sm:$0xff]  ;;  %v137_v8 = vld [vmem:[%s532_s3] sm:$0xff]  ;;  %s442_s18 = smov [#allocation6]  }
  0x15   :  { %v36_v5 = vld [vmem:[#allocation3] sm:$0xff]  ;;  %v373_v6 = vpack.c.bf16 %v41_v4, %v40_v2  ;;  %v37_v7 = vld [vmem:[#allocation3 + $0x8] sm:$0xff]  ;;  %353 = vmatprep.subr.mxu1 %v137_v8  ;;  %v131_v9 = vld [vmem:[%s530_s1] sm:$0xff]  ;;  %s309_s19 = sshll.u32 %s442_s18, 4  ;;  %s310_s19 = int_to_ptr.vmem [resolvable:$true] %s309_s19 }
  0x16   :  { %350 = vmatprep.mubr.msk.f32.mxu0 %vm42_vm0, %v36_v5  ;;  %370 = vmatprep.subr.bf16.mxu0 %v369_v3  ;;  %v132_v10 = vld [vmem:[%s530_s1 + $0x8] sm:$0xff]  ;;  %v133_v16 = vld [vmem:[%s530_s1 + $0x10] sm:$0xff]  ;;  %v134_v17 = vld [vmem:[%s530_s1 + $0x18] sm:$0xff]  ;;  %s413_s1 = scalar_lea.vmem %s310_s19, 256  ;;  %p418_p9 = scmp.lt.s32.totalorder %s310_s19, %s310_s19 }
  0x17   :  { %372 = vmatpush3.bf16.msra.mxu0 %v369_v3  ;;  %354 = vmatpush3.msra.mxu1 %v137_v8  ;;  %v377_v11 = vpack.c.bf16 %v132_v10, %v131_v9  ;;  %v381_v19 = vpack.c.bf16 %v134_v17, %v133_v16  ;;  %p414_p8 = scmp.ne.s32.totalorder %s310_s19, %s413_s1  ;;  %p419_p10 = scmp.lt.s32.totalorder %s413_s1, %s413_s1 }
  0x18   :  { %374 = vmatprep.subr.bf16.mxu0 %v373_v6 }
  0x19   :  { %378 = vmatprep.subr.bf16.mxu1 %v377_v11  ;;  %p420_p11 = por %p419_p10, %p418_p9 }
  0x1b   :  { %376 = vmatpush3.bf16.msra.mxu0 %v373_v6  ;;  %p421_p12 = pnand %p420_p11, %p414_p8 }
  0x1e   :  { %351 = vmatmul.mubr.msk.f32.vlgmr.msra.gmra.mrb[0].mxu0 %vm42_vm0, %v37_v7 }
  0xf1   :  { %v352_v12 = vpop.f32.mrb[0].mxu0 }
  0xf2   :  { %v125_v13 = vmul.f32 2.0, %v352_v12  ;;  %v115_v14 = vpop.f32.mrb[1].mxu0 }
  0xf3   :  { %v124_v15 = vmul.f32 2.0, %v115_v14 }
  0xf4   :  { %128 = vst.msk [vmem:[#allocation2 + $0x8] sm:$0xff] %vm126_vm1, %v125_v13 }
  0xf5   :  { %127 = vst.msk [vmem:[#allocation2] sm:$0xff] %vm126_vm1, %v124_v15 }
  0xfb   :  { %v136_v20 = vld [vmem:[#allocation2 + $0x8] sm:$0xff] }
  0xfc   :  { %v135_v18 = vld [vmem:[#allocation2] sm:$0xff] }
  0xfd   :  { %355 = vmatprep.mubr.msk.f32.mxu1 %vm126_vm1, %v135_v18 }
  0xfe   :  { %356 = vmatmul.mubr.msk.f32.vlgmr.msra.gmra.mrb[0].mxu1 %vm126_vm1, %v136_v20 }
  0xff   :  { %380 = vmatpush3.bf16.msra.mxu1 %v377_v11  ;;  %366 = vmatprep.mubr.msk.f32.mxu1 %vm42_vm0, %v36_v5 }
 0x100   :  { %382 = vmatprep.subr.bf16.mxu1 %v381_v19 }
 0x103   :  { %384 = vmatpush3.bf16.msra.mxu1 %v381_v19 }
 0x106   :  { %367 = vmatmul.mubr.msk.f32.vlgmr.msra.gmra.mrb[0].mxu1 %vm42_vm0, %v37_v7 }
 0x1d9   :  { %v368_v21 = vpop.f32.mrb[0].mxu1 }
 0x1da   :  { %303 = vst [vmem:[#allocation6 + $0x8] sm:$0xff] %v368_v21  ;;  %v293_v22 = vpop.f32.mrb[1].mxu1 }
 0x1db   :  { %302 = vst [vmem:[#allocation6] sm:$0xff] %v293_v22 }
 0x1dc   :  { %424 = shalt.err (!%p421_p12)
}
 0x1dd   :  { %s425_s22 = scalar_lea.hbm %s533_s4, 256 }
 0x1de   :  { %p426_p13 = scmp.ne.s32.totalorder %s533_s4, %s425_s22  ;;  %p429_p0 = scmp.lt.u32.totalorder %s425_s22, %s533_s4 }
 0x1e0   :  { %p431_p1 = pnand %p429_p0, %p426_p13 }
 0x1e2   :  { %434 = shalt.err (!%p431_p1)
}
 0x1e3   :  { %315 = dma.vmem_to_hbm [thread:$0]  %s310_s19, 256, %s533_s4, [#allocation5], %s440_s25, %s440_s25, %s441_s26  }
 0x1e4   :  { %437 = dma.done.wait [#allocation5], 256  }
 0x1e5   :  { %438 = vsyncadd [#allocation5], 4294967040 }
 0x1e6   :  { %319 = vsyncpa [#allocation4], 1 }
 0x1e7   :  { %320 = vsyncpa [#allocation5], 1 }

</bundles_post_ra>
